<compile_context>
chip_gen: v5e
topology: v5e:2x2
jax: 0.10.0
libtpu: 0.0.40
codegen_flags: <defaults>
</compile_context>

<pallas_src>
import jax
import jax.numpy as jnp
from jax import lax
from jax.experimental import pallas as pl
from jax.experimental.pallas import tpu as pltpu


HIDDEN = 128            # fc1 output width
DEFAULT_TB = 16384      # batch columns per grid step (lane axis)
LANE_CHUNK = 256        # batch columns processed per inner-loop iteration
MIN_SPLIT = 2048        # never split a grid step below this many batch columns


def _round_up(x, m):
    return (x + m - 1) // m * m


def _default_compute_dtype():
    """bf16 body on bf16-VALU chips (v6e / v7x), f32 otherwise (v5e and older / non-TPU)."""
    try:
        kind = jax.devices()[0].device_kind.lower()
    except Exception:
        return jnp.float32
    if "tpu" not in kind:
        return jnp.float32
    for old in ("v2", "v3", "v4", "v5"):
        if old in kind:
            return jnp.float32
    return jnp.bfloat16


def _make_kernel(chunk, n_chunks):
    """Build the per-tile kernel; `chunk`/`n_chunks` are static (closure)."""

    def kernel(x_ref, w1_ref, b1_ref, w2d_ref, b2d_ref, out_ref):
        # x_ref   : [2, TB]   input features (feature on sublane, batch on lane), compute dtype
        # w1_ref  : [128, 2]  fc1 weight (hidden on sublane), compute dtype
        # b1_ref  : [128, 1]  fc1 bias, compute dtype
        # w2d_ref : [128, 1]  fc2 weight difference w2[:,0]-w2[:,1], compute dtype
        # b2d_ref : [1, 1]    fc2 bias difference, f32
        # out_ref : [1, TB]   class-0 probability, f32

        # Hoisted lane-broadcasts of the tiny per-tile constants (JAX does not CSE
        # broadcast_in_dim; doing these inside the loop re-materializes them every iter).
        w1c0 = jnp.broadcast_to(w1_ref[:, 0:1], (HIDDEN, chunk))      # [128, C]
        w1c1 = jnp.broadcast_to(w1_ref[:, 1:2], (HIDDEN, chunk))      # [128, C]
        b1b = jnp.broadcast_to(b1_ref[...], (HIDDEN, chunk))          # [128, C]
        w2db = jnp.broadcast_to(w2d_ref[...], (HIDDEN, chunk))        # [128, C]
        b2db = jnp.broadcast_to(b2d_ref[...], (1, chunk))             # [1, C] f32

        def body(c, carry):
            off = pl.multiple_of(c * chunk, 128)
            # TODO(synk): a stride-0 sublane-broadcast load (pl.ds(..., stride=0)) would move
            # the x0/x1 sublane broadcast into the vld; kept as implicit broadcast for
            # lowering robustness.
            x0 = x_ref[0:1, pl.ds(off, chunk)]                         # [1, C]
            x1 = x_ref[1:2, pl.ds(off, chunk)]                         # [1, C]

            # fc1 + ReLU as a VPU broadcast-FMA (K=2 contraction would waste the MXU).
            h = jnp.maximum(w1c0 * x0 + w1c1 * x1 + b1b, 0.0)          # [128, C]

            # fc2 logit difference; hidden-axis reduction accumulates in f32.
            d = jnp.sum((h * w2db).astype(jnp.float32), axis=0, keepdims=True) + b2db

            # 2-class softmax: p0 = sigmoid(d); tanh form = one EUP op, no inf intermediate.
            out_ref[0:1, pl.ds(off, chunk)] = 0.5 * jnp.tanh(0.5 * d) + 0.5
            return carry

        lax.fori_loop(0, n_chunks, body, 0, unroll=min(2, n_chunks))

    return kernel


def policy_network_forward(x, w1, b1, w2, b2, *, tb=DEFAULT_TB, compute_dtype=None):
    """x: [B, 2] -> softmax probabilities [B, 2] float32.

    Weights are stored in-major (transposed vs. PyTorch): w1 [2,128], b1 [128],
    w2 [128,2], b2 [2].
    """
    if compute_dtype is None:
        compute_dtype = _default_compute_dtype()
    B = x.shape[0]

    # ---- batch tiling -------------------------------------------------------
    b128 = _round_up(B, 128)
    if b128 >= 2 * MIN_SPLIT:
        # >=2 grid steps with >=MIN_SPLIT columns each -> both v7x TensorCores get work.
        tb_target = _round_up(pl.cdiv(b128, 2), 128)
    else:
        tb_target = b128
    tb = min(tb, tb_target)
    if tb >= LANE_CHUNK:
        tb = _round_up(tb, LANE_CHUNK)
        chunk = LANE_CHUNK
    else:
        chunk = tb                       # tiny batch: single chunk (tb is a multiple of 128)
    n_chunks = tb // chunk
    b_pad = _round_up(B, tb)

    # ---- layout plumbing (tiny XLA ops; precompute the weight transforms once outside any
    # hot loop in a real training setup) --------------------------------------
    x_t = jnp.pad(x.astype(compute_dtype).T, ((0, 0), (0, b_pad - B)))        # [2, Bp]
    w1h = w1.astype(compute_dtype).T                                          # [128, 2]
    b1c = b1.astype(compute_dtype).reshape(HIDDEN, 1)                         # [128, 1]
    w2d = (w2[:, 0] - w2[:, 1]).astype(compute_dtype).reshape(HIDDEN, 1)      # [128, 1]
    b2d = (b2[0] - b2[1]).astype(jnp.float32).reshape(1, 1)                   # [1, 1]

    full = lambda a: pl.BlockSpec(a.shape, lambda i: (0, 0))

    p0_row = pl.pallas_call(
        _make_kernel(chunk, n_chunks),
        out_shape=jax.ShapeDtypeStruct((1, b_pad), jnp.float32),
        grid=(b_pad // tb,),
        in_specs=[
            pl.BlockSpec((2, tb), lambda i: (0, i)),   # x tile: batch on the lane axis
            full(w1h),
            full(b1c),
            full(w2d),
            full(b2d),
        ],
        out_specs=pl.BlockSpec((1, tb), lambda i: (0, i)),
        compiler_params=pltpu.CompilerParams(
            dimension_semantics=("parallel",),         # independent batch tiles
        ),
    )(x_t, w1h, b1c, w2d, b2d)

    p0 = p0_row[0, :B]
    return jnp.stack([p0, 1.0 - p0], axis=1)           # class-1 = 1 - p0 in the wrapper (free)


def init_params(key):
    """Deterministic init matching nn.Linear shapes: fc1 (2->128), fc2 (128->2)."""
    k1, k2, k3, k4 = jax.random.split(key, 4)
    bound1 = 1.0 / jnp.sqrt(2.0)
    bound2 = 1.0 / jnp.sqrt(128.0)
    w1 = jax.random.uniform(k1, (2, HIDDEN), jnp.float32, -bound1, bound1)
    b1 = jax.random.uniform(k2, (HIDDEN,), jnp.float32, -bound1, bound1)
    w2 = jax.random.uniform(k3, (HIDDEN, 2), jnp.float32, -bound2, bound2)
    b2 = jax.random.uniform(k4, (2,), jnp.float32, -bound2, bound2)
    return w1, b1, w2, b2


def _reference(x, w1, b1, w2, b2):
    h = jnp.maximum(x @ w1 + b1, 0.0)
    return jax.nn.softmax(h @ w2 + b2, axis=1)


if __name__ == "__main__":
    key = jax.random.PRNGKey(0)
    kx, kp, kx2 = jax.random.split(key, 3)

    w1, b1, w2, b2 = init_params(kp)
    cdt = _default_compute_dtype()
    tol = 3e-2 if cdt == jnp.bfloat16 else 1e-5

    # Small "production-like" batch of states (each state has 2 features).
    B = 8
    x = jax.random.normal(kx, (B, 2), dtype=jnp.float32)
    probs = jax.block_until_ready(policy_network_forward(x, w1, b1, w2, b2))
    ref = _reference(x, w1, b1, w2, b2)
    assert probs.shape == (B, 2)
    assert jnp.allclose(probs, ref, atol=tol, rtol=tol), float(jnp.max(jnp.abs(probs - ref)))
    assert jnp.allclose(jnp.sum(probs, axis=1), 1.0, atol=1e-3)

    # Larger batch: exercises the multi-chunk inner loop and the 2-step (megacore) grid.
    B2 = 4500
    x2 = jax.random.normal(kx2, (B2, 2), dtype=jnp.float32)
    probs2 = jax.block_until_ready(policy_network_forward(x2, w1, b1, w2, b2))
    ref2 = _reference(x2, w1, b1, w2, b2)
    assert probs2.shape == (B2, 2)
    assert jnp.allclose(probs2, ref2, atol=tol, rtol=tol), float(jnp.max(jnp.abs(probs2 - ref2)))

    print("KERNEL_OK")
</pallas_src>

<mosaic_0001>
module attributes {stable_mosaic.version = 11 : i64} {
  func.func @kernel(%arg0: i32, %arg1: memref<2x128xf32, #tpu.memory_space<vmem>>, %arg2: memref<128x2xf32, #tpu.memory_space<vmem>>, %arg3: memref<128x1xf32, #tpu.memory_space<vmem>>, %arg4: memref<128x1xf32, #tpu.memory_space<vmem>>, %arg5: memref<1x1xf32, #tpu.memory_space<vmem>>, %arg6: memref<1x128xf32, #tpu.memory_space<vmem>>) attributes {dimension_semantics = [#tpu.dimension_semantics<parallel>], iteration_bounds = array<i64: 1>, scalar_prefetch = 0 : i64, scratch_operands = 0 : i64, tpu.core_type = #tpu.core_type<tc>, window_params = [{transform_indices = @transform_0, window_bounds = array<i64: 2, 128>}, {pipeline_mode = #tpu.pipeline_mode<synchronous>, transform_indices = @transform_1, window_bounds = array<i64: 128, 2>}, {pipeline_mode = #tpu.pipeline_mode<synchronous>, transform_indices = @transform_2, window_bounds = array<i64: 128, 1>}, {pipeline_mode = #tpu.pipeline_mode<synchronous>, transform_indices = @transform_3, window_bounds = array<i64: 128, 1>}, {pipeline_mode = #tpu.pipeline_mode<synchronous>, transform_indices = @transform_4, window_bounds = array<i64: 1, 1>}, {transform_indices = @transform_5, window_bounds = array<i64: 1, 128>}]} {
    %c0 = arith.constant 0 : index
    %c0_0 = arith.constant 0 : index
    %0 = vector.load %arg2[%c0, %c0_0] : memref<128x2xf32, #tpu.memory_space<vmem>>, vector<128x1xf32>
    %1 = vector.shape_cast %0 : vector<128x1xf32> to vector<128x1xf32>
    %2 = vector.broadcast %1 : vector<128x1xf32> to vector<128x128xf32>
    %c0_1 = arith.constant 0 : index
    %c1 = arith.constant 1 : index
    %3 = vector.load %arg2[%c0_1, %c1] : memref<128x2xf32, #tpu.memory_space<vmem>>, vector<128x1xf32>
    %4 = vector.shape_cast %3 : vector<128x1xf32> to vector<128x1xf32>
    %5 = vector.broadcast %4 : vector<128x1xf32> to vector<128x128xf32>
    %c0_2 = arith.constant 0 : index
    %c0_3 = arith.constant 0 : index
    %6 = vector.load %arg3[%c0_2, %c0_3] : memref<128x1xf32, #tpu.memory_space<vmem>>, vector<128x1xf32>
    %7 = vector.shape_cast %6 : vector<128x1xf32> to vector<128x1xf32>
    %8 = vector.broadcast %7 : vector<128x1xf32> to vector<128x128xf32>
    %c0_4 = arith.constant 0 : index
    %c0_5 = arith.constant 0 : index
    %9 = vector.load %arg4[%c0_4, %c0_5] : memref<128x1xf32, #tpu.memory_space<vmem>>, vector<128x1xf32>
    %10 = vector.shape_cast %9 : vector<128x1xf32> to vector<128x1xf32>
    %11 = vector.broadcast %10 : vector<128x1xf32> to vector<128x128xf32>
    %c0_6 = arith.constant 0 : index
    %c0_7 = arith.constant 0 : index
    %12 = vector.load %arg5[%c0_6, %c0_7] : memref<1x1xf32, #tpu.memory_space<vmem>>, vector<1x1xf32>
    %13 = vector.shape_cast %12 : vector<1x1xf32> to vector<1x1xf32>
    %14 = vector.broadcast %13 : vector<1x1xf32> to vector<1x128xf32>
    %c0_i32 = arith.constant 0 : i32
    %c128_i32 = arith.constant 128 : i32
    %15 = arith.muli %c0_i32, %c128_i32 : i32
    %16 = tpu.assume_multiple %15, 128 : i32
    %c0_8 = arith.constant 0 : index
    %17 = arith.index_cast %16 : i32 to index
    %18 = vector.load %arg1[%c0_8, %17] : memref<2x128xf32, #tpu.memory_space<vmem>>, vector<1x128xf32>
    %c1_9 = arith.constant 1 : index
    %19 = arith.index_cast %16 : i32 to index
    %20 = vector.load %arg1[%c1_9, %19] : memref<2x128xf32, #tpu.memory_space<vmem>>, vector<1x128xf32>
    %21 = vector.broadcast %18 : vector<1x128xf32> to vector<128x128xf32>
    %22 = arith.mulf %2, %21 : vector<128x128xf32>
    %23 = vector.broadcast %20 : vector<1x128xf32> to vector<128x128xf32>
    %24 = arith.mulf %5, %23 : vector<128x128xf32>
    %25 = arith.addf %22, %24 : vector<128x128xf32>
    %26 = arith.addf %25, %8 : vector<128x128xf32>
    %cst = arith.constant 0.000000e+00 : f32
    %27 = vector.broadcast %cst : f32 to vector<128x128xf32>
    %28 = arith.maximumf %26, %27 : vector<128x128xf32>
    %29 = arith.mulf %28, %11 : vector<128x128xf32>
    %cst_10 = arith.constant dense<0.000000e+00> : vector<128xf32>
    %30 = vector.multi_reduction <add>, %29, %cst_10 [0] : vector<128x128xf32> to vector<128xf32>
    %31 = vector.shape_cast %30 : vector<128xf32> to vector<1x128xf32>
    %32 = arith.addf %31, %14 : vector<1x128xf32>
    %cst_11 = arith.constant 5.000000e-01 : f32
    %33 = vector.broadcast %cst_11 : f32 to vector<1x128xf32>
    %34 = arith.mulf %33, %32 : vector<1x128xf32>
    %35 = math.tanh %34 : vector<1x128xf32>
    %cst_12 = arith.constant 5.000000e-01 : f32
    %36 = vector.broadcast %cst_12 : f32 to vector<1x128xf32>
    %37 = arith.mulf %36, %35 : vector<1x128xf32>
    %cst_13 = arith.constant 5.000000e-01 : f32
    %38 = vector.broadcast %cst_13 : f32 to vector<1x128xf32>
    %39 = arith.addf %37, %38 : vector<1x128xf32>
    %c0_14 = arith.constant 0 : index
    %40 = arith.index_cast %16 : i32 to index
    %41 = vector.load %arg6[%c0_14, %40] : memref<1x128xf32, #tpu.memory_space<vmem>>, vector<1x128xf32>
    tpu.vector_store %arg6[%c0_14, %40], %39 {strides = array<i32>} : memref<1x128xf32, #tpu.memory_space<vmem>>, vector<1x128xf32>,
    %c1_i32 = arith.constant 1 : i32
    return
  }
  func.func @transform_0(%arg0: i32) -> (i32, i32) {
    %c0_i32 = arith.constant 0 : i32
    %c0_i32_0 = arith.constant 0 : i32
    return %c0_i32, %arg0 : i32, i32
  }
  func.func @transform_1(%arg0: i32) -> (i32, i32) {
    %c0_i32 = arith.constant 0 : i32
    %c0_i32_0 = arith.constant 0 : i32
    %c0_i32_1 = arith.constant 0 : i32
    return %c0_i32, %c0_i32_0 : i32, i32
  }
  func.func @transform_2(%arg0: i32) -> (i32, i32) {
    %c0_i32 = arith.constant 0 : i32
    %c0_i32_0 = arith.constant 0 : i32
    %c0_i32_1 = arith.constant 0 : i32
    return %c0_i32, %c0_i32_0 : i32, i32
  }
  func.func @transform_3(%arg0: i32) -> (i32, i32) {
    %c0_i32 = arith.constant 0 : i32
    %c0_i32_0 = arith.constant 0 : i32
    %c0_i32_1 = arith.constant 0 : i32
    return %c0_i32, %c0_i32_0 : i32, i32
  }
  func.func @transform_4(%arg0: i32) -> (i32, i32) {
    %c0_i32 = arith.constant 0 : i32
    %c0_i32_0 = arith.constant 0 : i32
    %c0_i32_1 = arith.constant 0 : i32
    return %c0_i32, %c0_i32_0 : i32, i32
  }
  func.func @transform_5(%arg0: i32) -> (i32, i32) {
    %c0_i32 = arith.constant 0 : i32
    %c0_i32_0 = arith.constant 0 : i32
    return %c0_i32, %arg0 : i32, i32
  }
}

</mosaic_0001>

<bundles_post_ra>
// kernel: tpu_custom_call.1
= control target key start
LH: loop header
LB: loop body
LE: loop exit
PB: predicated region body
PF: predicated region fallthrough
CT: control target
= control target key end

     0   :  { %s848_s0 = inlined_call_operand.vmem [shape: f32[2,128], index: 0, kind: input, shape index: {}]   ;;  %s849_s1 = inlined_call_operand.vmem [shape: f32[128,2], index: 1, kind: input, shape index: {}]   ;;  %s850_s2 = inlined_call_operand.vmem [shape: f32[128,1], index: 2, kind: input, shape index: {}]   ;;  %s851_s3 = inlined_call_operand.vmem [shape: f32[128,1], index: 3, kind: input, shape index: {}]   ;;  %s852_s4 = inlined_call_operand.<no memory space> [shape: f32[1,1], index: 4, kind: input, shape index: {}]   ;;  %s853_s5 = inlined_call_operand.hbm [shape: f32[1,128], index: 5, kind: output, shape index: {}]  }
   0x1   :  { %v10_v0 = vstv %s852_s4 }
   0x2   :  { %11 = vst [vmem:[#allocation2] sm:$0x1] %v10_v0 }
   0x3   :  { %v27_v1 = vld [vmem:[%s849_s1 + $0x20] sm:$0xff]  ;;  %v25_v2 = vld [vmem:[%s849_s1 + $0x10] sm:$0xff]  ;;  %v566_v3 = vmov 1   ;;  %v567_v4 = vmov 0  }
   0x4   :  { %532 = vset.pattern.permute.xlu0 %v566_v3  ;;  %529 = vset.pattern.permute.xlu2 %v567_v4 }
   0x5   :  { %528 = vset.pattern.permute.xlu1 %v567_v4  ;;  %61 = vperm.xlu2 %529, %v27_v1  }
   0x6   :  { %128 = vperm.xlu0 %532, %v25_v2   ;;  %51 = vperm.xlu1 %528, %v25_v2  }
   0x7   :  { %12 = vsyncpa [#allocation4], 0  ;;  %v28_v5 = vld [vmem:[%s849_s1 + $0x28] sm:$0xff]  ;;  %v30_v6 = vld [vmem:[%s849_s1 + $0x38] sm:$0xff]  ;;  %s516_s13 = sshll.u32 %s853_s5, 4  ;;  %s517_s13 = int_to_ptr.hbm [resolvable:$true] %s516_s13 }
   0x8   :  { %v26_v7 = vld [vmem:[%s849_s1 + $0x18] sm:$0xff]  ;;  %v31_v8 = vld [vmem:[%s849_s1 + $0x40] sm:$0xff]  ;;  %v33_v9 = vld [vmem:[%s849_s1 + $0x50] sm:$0xff] }
   0x9   :  { %v34_v10 = vld [vmem:[%s849_s1 + $0x58] sm:$0xff]  ;;  %v36_v11 = vld [vmem:[%s849_s1 + $0x68] sm:$0xff]  ;;  %v37_v12 = vld [vmem:[%s849_s1 + $0x70] sm:$0xff] }
   0xa   :  { %v23_v13 = vld [vmem:[%s849_s1] sm:$0xff]  ;;  %v24_v14 = vld [vmem:[%s849_s1 + $0x8] sm:$0xff]  ;;  %v29_v15 = vld [vmem:[%s849_s1 + $0x30] sm:$0xff] }
   0xb   :  { %v32_v16 = vld [vmem:[%s849_s1 + $0x48] sm:$0xff]  ;;  %v35_v17 = vld [vmem:[%s849_s1 + $0x60] sm:$0xff]  ;;  %v38_v18 = vld [vmem:[%s849_s1 + $0x78] sm:$0xff] }
   0xc   :  { %v183_v19 = vld [vmem:[%s850_s2] sm:$0xff]  ;;  %v188_v20 = vld [vmem:[%s850_s2 + $0x28] sm:$0xff]  ;;  %v185_v21 = vld [vmem:[%s850_s2 + $0x10] sm:$0xff] }
   0xd   :  { %66 = vperm.xlu2 %529, %v28_v5   ;;  %v184_v22 = vld [vmem:[%s850_s2 + $0x8] sm:$0xff]  ;;  %v191_v24 = vld [vmem:[%s850_s2 + $0x40] sm:$0xff]  ;;  %v186_v26 = vld [vmem:[%s850_s2 + $0x18] sm:$0xff] }
   0xe   :  { %148 = vperm.xlu0 %532, %v30_v6   ;;  %56 = vperm.xlu1 %528, %v26_v7   ;;  %v187_v25 = vld [vmem:[%s850_s2 + $0x20] sm:$0xff]  ;;  %v194_v28 = vld [vmem:[%s850_s2 + $0x58] sm:$0xff]  ;;  %v189_v30 = vld [vmem:[%s850_s2 + $0x30] sm:$0xff] }
   0xf   :  { %v190_v29 = vld [vmem:[%s850_s2 + $0x38] sm:$0xff]  ;;  %v689_v32 = vld [vmem:[%s848_s0] ss:$0 sm:$0xff]  ;;  %v197_v33 = vld [vmem:[%s850_s2 + $0x70] sm:$0xff] }
  0x10   :  { %v697_v34 = vld [vmem:[%s848_s0 + $0x1] ss:$0 sm:$0xff]  ;;  %v193_v35 = vld [vmem:[%s850_s2 + $0x50] sm:$0xff]  ;;  %v192_v36 = vld [vmem:[%s850_s2 + $0x48] sm:$0xff] }
  0x11   :  { %v280_v43 = vld [vmem:[%s851_s3 + $0x8] sm:$0xff]  ;;  %v195_v45 = vld [vmem:[%s850_s2 + $0x60] sm:$0xff]  ;;  %v198_v51 = vld [vmem:[%s850_s2 + $0x78] sm:$0xff] }
  0x12   :  { %v196_v44 = vld [vmem:[%s850_s2 + $0x68] sm:$0xff]  ;;  %v283_v49 = vld [vmem:[%s851_s3 + $0x20] sm:$0xff]  ;;  %v286_v58 = vld [vmem:[%s851_s3 + $0x38] sm:$0xff] }
  0x13   :  { %v279_v50 = vld [vmem:[%s851_s3] sm:$0xff]  ;;  %v282_v59 = vld [vmem:[%s851_s3 + $0x18] sm:$0xff]  ;;  %v281_v60 = vld [vmem:[%s851_s3 + $0x10] sm:$0xff] }
  0x15   :  { %81 = vperm.xlu2 %529, %v31_v8  }
  0x16   :  { %160 = vperm.xlu0 %532, %v33_v9   ;;  %76 = vperm.xlu1 %528, %v30_v6  }
  0x1d   :  { %96 = vperm.xlu2 %529, %v34_v10  }
  0x1e   :  { %172 = vperm.xlu0 %532, %v36_v11   ;;  %91 = vperm.xlu1 %528, %v33_v9  }
  0x25   :  { %111 = vperm.xlu2 %529, %v37_v12  }
  0x26   :  { %533 = vset.pattern.permute.xlu0 %v567_v4  ;;  %106 = vperm.xlu1 %528, %v36_v11  }
  0x27   :  { %41 = vperm.xlu0 %533, %v23_v13  }
  0x2d   :  { %531 = vset.pattern.permute.xlu2 %v566_v3 }
  0x2e   :  { %530 = vset.pattern.permute.xlu1 %v566_v3  ;;  %124 = vperm.xlu2 %531, %v24_v14  }
  0x2f   :  { %46 = vperm.xlu0 %533, %v24_v14   ;;  %120 = vperm.xlu1 %530, %v23_v13  }
  0x36   :  { %136 = vperm.xlu2 %531, %v27_v1  }
  0x37   :  { %71 = vperm.xlu0 %533, %v29_v15   ;;  %132 = vperm.xlu1 %530, %v26_v7   ;;  %v285_v7 = vld [vmem:[%s851_s3 + $0x30] sm:$0xff] }
  0x3e   :  { %144 = vperm.xlu2 %531, %v29_v15   ;;  %v292_v15 = vld [vmem:[%s851_s3 + $0x68] sm:$0xff] }
  0x3f   :  { %86 = vperm.xlu0 %533, %v32_v16   ;;  %140 = vperm.xlu1 %530, %v28_v5   ;;  %v289_v5 = vld [vmem:[%s851_s3 + $0x50] sm:$0xff] }
  0x46   :  { %156 = vperm.xlu2 %531, %v32_v16   ;;  %v288_v16 = vld [vmem:[%s851_s3 + $0x48] sm:$0xff] }
  0x47   :  { %101 = vperm.xlu0 %533, %v35_v17   ;;  %152 = vperm.xlu1 %530, %v31_v8   ;;  %v284_v8 = vld [vmem:[%s851_s3 + $0x28] sm:$0xff] }
  0x4e   :  { %168 = vperm.xlu2 %531, %v35_v17   ;;  %v287_v17 = vld [vmem:[%s851_s3 + $0x40] sm:$0xff] }
  0x4f   :  { %116 = vperm.xlu0 %533, %v38_v18   ;;  %164 = vperm.xlu1 %530, %v34_v10  }
  0x56   :  { %180 = vperm.xlu2 %531, %v38_v18  }
  0x57   :  { %201 = vperm.xlu0 %533, %v183_v19   ;;  %176 = vperm.xlu1 %530, %v37_v12  }
  0x5e   :  { %535 = vset.pattern.permute.xlu2 %v567_v4 }
  0x5f   :  { %226 = vperm.xlu0 %533, %v188_v20   ;;  %534 = vset.pattern.permute.xlu1 %v567_v4  ;;  %v662_v23 = vpop.permute.xlu2 %61 }
  0x60   :  { %211 = vperm.xlu2 %535, %v185_v21   ;;  %206 = vperm.xlu1 %534, %v184_v22   ;;  %v389_v2 = vmul.f32 %v689_v32, %v662_v23 }
  0x67   :  { %241 = vperm.xlu0 %533, %v191_v24   ;;  %v673_v27 = vpop.permute.xlu2 %66 }
  0x68   :  { %221 = vperm.xlu2 %535, %v187_v25   ;;  %216 = vperm.xlu1 %534, %v186_v26   ;;  %v375_v25 = vld [vmem:[#allocation2] sm:$0x1] }
  0x6f   :  { %256 = vperm.xlu0 %533, %v194_v28   ;;  %v684_v31 = vpop.permute.xlu2 %81  ;;  %v291_v28 = vld [vmem:[%s851_s3 + $0x60] sm:$0xff] }
  0x70   :  { %236 = vperm.xlu2 %535, %v190_v29   ;;  %231 = vperm.xlu1 %534, %v189_v30   ;;  %v290_v29 = vld [vmem:[%s851_s3 + $0x58] sm:$0xff] }
  0x77   :  { %271 = vperm.xlu0 %533, %v197_v33   ;;  %v705_v37 = vpop.permute.xlu2 %96 }
  0x78   :  { %v129_v38 = vpop.permute.xlu0 %128  ;;  %v52_v39 = vpop.permute.xlu1 %51  ;;  %251 = vperm.xlu2 %535, %v193_v35   ;;  %246 = vperm.xlu1 %534, %v192_v36  }
  0x79   :  { %v404_v40 = vmul.f32 %v697_v34, %v129_v38  ;;  %v387_v41 = vmul.f32 %v689_v32, %v52_v39 }
  0x7b   :  { %v709_v42 = vadd.f32 %v404_v40, %v387_v41 }
  0x7f   :  { %302 = vperm.xlu0 %533, %v280_v43   ;;  %v720_v46 = vpop.permute.xlu2 %111 }
  0x80   :  { %v149_v47 = vpop.permute.xlu0 %148  ;;  %v722_v48 = vpop.permute.xlu1 %56  ;;  %266 = vperm.xlu2 %535, %v196_v44   ;;  %261 = vperm.xlu1 %534, %v195_v45   ;;  %v294_v44 = vld [vmem:[%s851_s3 + $0x78] sm:$0xff]  ;;  %v293_v45 = vld [vmem:[%s851_s3 + $0x70] sm:$0xff]  ;;  %s568_s3 = smov [#allocation3]  }
  0x81   :  { %v409_v52 = vmul.f32 %v697_v34, %v149_v47  ;;  %v388_v40 = vmul.f32 %v689_v32, %v722_v48  ;;  %s514_s10 = sshll.u32 %s568_s3, 4  ;;  %s515_s10 = int_to_ptr.vmem [resolvable:$true] %s514_s10 }
  0x87   :  { %317 = vperm.xlu0 %533, %v283_v49  }
  0x88   :  { %v161_v53 = vpop.permute.xlu0 %160  ;;  %v77_v54 = vpop.permute.xlu1 %76  ;;  %297 = vperm.xlu2 %535, %v279_v50   ;;  %276 = vperm.xlu1 %534, %v198_v51  }
  0x89   :  { %v392_v55 = vmul.f32 %v689_v32, %v77_v54  ;;  %v125_v56 = vpop.permute.xlu2 %124  ;;  %v412_v63 = vmul.f32 %v697_v34, %v161_v53 }
  0x8a   :  { %v403_v18 = vmul.f32 %v697_v34, %v125_v56 }
  0x8b   :  { %v735_v57 = vadd.f32 %v409_v52, %v392_v55  ;;  %v390_v52 = vmul.f32 %v689_v32, %v673_v27 }
  0x8f   :  { %332 = vperm.xlu0 %533, %v286_v58  }
  0x90   :  { %v173_v61 = vpop.permute.xlu0 %172  ;;  %v92_v62 = vpop.permute.xlu1 %91  ;;  %312 = vperm.xlu2 %535, %v282_v59   ;;  %307 = vperm.xlu1 %534, %v281_v60  }
  0x91   :  { %v395_v0 = vmul.f32 %v689_v32, %v92_v62  ;;  %v137_v1 = vpop.permute.xlu2 %136  ;;  %v415_v10 = vmul.f32 %v697_v34, %v173_v61  ;;  %v393_v62 = vmul.f32 %v689_v32, %v684_v31 }
  0x92   :  { %v406_v3 = vmul.f32 %v697_v34, %v137_v1 }
  0x93   :  { %v751_v4 = vadd.f32 %v412_v63, %v395_v0 }
  0x94   :  { %v756_v6 = vadd.f32 %v406_v3, %v389_v2 }
  0x97   :  { %347 = vperm.xlu0 %533, %v289_v5  }
  0x98   :  { %v107_v9 = vpop.permute.xlu1 %106  ;;  %327 = vperm.xlu2 %535, %v285_v7   ;;  %322 = vperm.xlu1 %534, %v284_v8   ;;  %v396_v8 = vmul.f32 %v689_v32, %v705_v37 }
  0x99   :  { %v398_v11 = vmul.f32 %v689_v32, %v107_v9  ;;  %v145_v12 = vpop.permute.xlu2 %144  ;;  %v42_v13 = vpop.permute.xlu0 %41 }
  0x9a   :  { %v385_v19 = vmul.f32 %v689_v32, %v42_v13  ;;  %v408_v36 = vmul.f32 %v697_v34, %v145_v12 }
  0x9b   :  { %v766_v14 = vadd.f32 %v415_v10, %v398_v11 }
  0x9f   :  { %362 = vperm.xlu0 %533, %v292_v15   ;;  %v399_v15 = vmul.f32 %v689_v32, %v720_v46 }
  0xa0   :  { %342 = vperm.xlu2 %535, %v288_v16   ;;  %337 = vperm.xlu1 %534, %v287_v17  }
  0xa1   :  { %v157_v20 = vpop.permute.xlu2 %156  ;;  %v47_v21 = vpop.permute.xlu0 %46 }
  0xa2   :  { %v386_v22 = vmul.f32 %v689_v32, %v47_v21  ;;  %v121_v23 = vpop.permute.xlu1 %120  ;;  %v411_v50 = vmul.f32 %v697_v34, %v157_v20 }
  0xa3   :  { %v402_v24 = vmul.f32 %v697_v34, %v121_v23 }
  0xa4   :  { %v781_v26 = vadd.f32 %v403_v18, %v386_v22 }
  0xa5   :  { %v418_v30 = vadd.f32 %v402_v24, %v385_v19 }
  0xa7   :  { %378 = vperm.xlu0 %533, %v375_v25  }
  0xa8   :  { %357 = vperm.xlu2 %535, %v291_v28   ;;  %352 = vperm.xlu1 %534, %v290_v29  }
  0xa9   :  { %v169_v33 = vpop.permute.xlu2 %168  ;;  %v72_v35 = vpop.permute.xlu0 %71 }
  0xaa   :  { %v391_v38 = vmul.f32 %v689_v32, %v72_v35  ;;  %v133_v39 = vpop.permute.xlu1 %132  ;;  %v414_v59 = vmul.f32 %v697_v34, %v169_v33 }
  0xab   :  { %v405_v41 = vmul.f32 %v697_v34, %v133_v39 }
  0xac   :  { %v794_v43 = vadd.f32 %v408_v36, %v391_v38 }
  0xad   :  { %v421_v47 = vadd.f32 %v405_v41, %v388_v40 }
  0xb0   :  { %372 = vperm.xlu2 %535, %v294_v44   ;;  %367 = vperm.xlu1 %534, %v293_v45  }
  0xb1   :  { %v87_v49 = vpop.permute.xlu0 %86  ;;  %v181_v53 = vpop.permute.xlu2 %180 }
  0xb2   :  { %v394_v48 = vmul.f32 %v689_v32, %v87_v49  ;;  %v141_v51 = vpop.permute.xlu1 %140  ;;  %v417_v3 = vmul.f32 %v697_v34, %v181_v53 }
  0xb3   :  { %v407_v54 = vmul.f32 %v697_v34, %v141_v51 }
  0xb4   :  { %v807_v55 = vadd.f32 %v411_v50, %v394_v48 }
  0xb5   :  { %v423_v56 = vadd.f32 %v407_v54, %v390_v52 }
  0xb9   :  { %v102_v58 = vpop.permute.xlu0 %101 }
  0xba   :  { %v397_v60 = vmul.f32 %v689_v32, %v102_v58  ;;  %v153_v61 = vpop.permute.xlu1 %152  ;;  %v212_v27 = vpop.permute.xlu2 %211 }
  0xbb   :  { %v410_v63 = vmul.f32 %v697_v34, %v153_v61  ;;  %v436_v49 = vadd.f32 %v709_v42, %v212_v27 }
  0xbc   :  { %v814_v0 = vadd.f32 %v414_v59, %v397_v60 }
  0xbd   :  { %v426_v1 = vadd.f32 %v410_v63, %v393_v62  ;;  %v452_v51 = vmax.f32 %v436_v49, 0.0 }
  0xc1   :  { %v117_v2 = vpop.permute.xlu0 %116 }
  0xc2   :  { %v400_v5 = vmul.f32 %v689_v32, %v117_v2  ;;  %v165_v7 = vpop.permute.xlu1 %164  ;;  %v222_v11 = vpop.permute.xlu2 %221 }
  0xc3   :  { %v413_v9 = vmul.f32 %v697_v34, %v165_v7  ;;  %v438_v52 = vadd.f32 %v756_v6, %v222_v11 }
  0xc4   :  { %v821_v10 = vadd.f32 %v417_v3, %v400_v5 }
  0xc5   :  { %v823_v31 = vadd.f32 %v413_v9, %v396_v8  ;;  %v454_v58 = vmax.f32 %v438_v52, 0.0 }
  0xc9   :  { %v202_v12 = vpop.permute.xlu0 %201 }
  0xca   :  { %v177_v13 = vpop.permute.xlu1 %176  ;;  %v237_v18 = vpop.permute.xlu2 %236  ;;  %v434_v33 = vadd.f32 %v418_v30, %v202_v12 }
  0xcb   :  { %v416_v16 = vmul.f32 %v697_v34, %v177_v13  ;;  %v441_v42 = vadd.f32 %v735_v57, %v237_v18 }
  0xcc   :  { %v450_v46 = vmax.f32 %v434_v33, 0.0 }
  0xcd   :  { %v828_v17 = vadd.f32 %v416_v16, %v399_v15  ;;  %v457_v8 = vmax.f32 %v441_v42, 0.0 }
  0xd1   :  { %v227_v19 = vpop.permute.xlu0 %226 }
  0xd2   :  { %v207_v20 = vpop.permute.xlu1 %206  ;;  %v252_v22 = vpop.permute.xlu2 %251  ;;  %v439_v59 = vadd.f32 %v423_v56, %v227_v19 }
  0xd3   :  { %v435_v35 = vadd.f32 %v781_v26, %v207_v20 }
  0xd4   :  { %v455_v27 = vmax.f32 %v439_v59, 0.0 }
  0xd5   :  { %v451_v34 = vmax.f32 %v435_v35, 0.0 }
  0xd9   :  { %v242_v37 = vpop.permute.xlu0 %241 }
  0xda   :  { %v217_v21 = vpop.permute.xlu1 %216  ;;  %v267_v25 = vpop.permute.xlu2 %266  ;;  %v442_v9 = vadd.f32 %v426_v1, %v242_v37 }
  0xdb   :  { %v437_v48 = vadd.f32 %v421_v47, %v217_v21 }
  0xdc   :  { %v458_v19 = vmax.f32 %v442_v9, 0.0 }
  0xdd   :  { %v453_v53 = vmax.f32 %v437_v48, 0.0 }
  0xe1   :  { %v257_v23 = vpop.permute.xlu0 %256 }
  0xe2   :  { %v232_v24 = vpop.permute.xlu1 %231  ;;  %v298_v32 = vpop.permute.xlu2 %297  ;;  %v445_v35 = vadd.f32 %v823_v31, %v257_v23 }
  0xe3   :  { %v466_v38 = vmul.f32 %v450_v46, %v298_v32  ;;  %v440_v62 = vadd.f32 %v794_v43, %v232_v24  ;;  %v444_v43 = vadd.f32 %v751_v4, %v252_v22 }
  0xe5   :  { %v456_v7 = vmax.f32 %v440_v62, 0.0  ;;  %v460_v33 = vmax.f32 %v444_v43, 0.0 }
  0xe9   :  { %v830_v28 = vpop.permute.xlu0 %271 }
  0xea   :  { %v247_v29 = vpop.permute.xlu1 %246  ;;  %v313_v44 = vpop.permute.xlu2 %312  ;;  %v448_v49 = vadd.f32 %v828_v17, %v830_v28 }
  0xeb   :  { %v469_v60 = vmul.f32 %v453_v53, %v313_v44  ;;  %v443_v56 = vadd.f32 %v807_v55, %v247_v29  ;;  %v447_v29 = vadd.f32 %v766_v14, %v267_v25 }
  0xec   :  { %v464_v48 = vmax.f32 %v448_v49, 0.0 }
  0xed   :  { %v459_v18 = vmax.f32 %v443_v56, 0.0  ;;  %v463_v44 = vmax.f32 %v447_v29, 0.0 }
  0xf1   :  { %v303_v36 = vpop.permute.xlu0 %302 }
  0xf2   :  { %v467_v39 = vmul.f32 %v451_v34, %v303_v36  ;;  %v262_v40 = vpop.permute.xlu1 %261  ;;  %v328_v54 = vpop.permute.xlu2 %327  ;;  %v461_v36 = vmax.f32 %v445_v35, 0.0 }
  0xf3   :  { %v472_v11 = vmul.f32 %v456_v7, %v328_v54  ;;  %v446_v37 = vadd.f32 %v814_v0, %v262_v40 }
  0xf4   :  { %v482_v41 = vadd.f32 %v467_v39, %v466_v38 }
  0xf5   :  { %v462_v38 = vmax.f32 %v446_v37, 0.0 }
  0xf9   :  { %v318_v50 = vpop.permute.xlu0 %317 }
  0xfa   :  { %v277_v45 = vpop.permute.xlu1 %276  ;;  %v470_v63 = vmul.f32 %v454_v58, %v318_v50  ;;  %v343_v13 = vpop.permute.xlu2 %342 }
  0xfb   :  { %v475_v32 = vmul.f32 %v459_v18, %v343_v13  ;;  %v449_v50 = vadd.f32 %v821_v10, %v277_v45 }
  0xfd   :  { %v465_v25 = vmax.f32 %v449_v50, 0.0 }
 0x101   :  { %v333_v3 = vpop.permute.xlu0 %332 }
 0x102   :  { %v308_v30 = vpop.permute.xlu1 %307  ;;  %v473_v15 = vmul.f32 %v457_v8, %v333_v3  ;;  %v358_v55 = vpop.permute.xlu2 %357 }
 0x103   :  { %v468_v26 = vmul.f32 %v452_v51, %v308_v30  ;;  %v478_v31 = vmul.f32 %v462_v38, %v358_v55 }
 0x105   :  { %v483_v61 = vadd.f32 %v482_v41, %v468_v26 }
 0x107   :  { %v484_v2 = vadd.f32 %v483_v61, %v469_v60 }
 0x109   :  { %v485_v47 = vadd.f32 %v484_v2, %v470_v63  ;;  %v348_v21 = vpop.permute.xlu0 %347 }
 0x10a   :  { %v323_v5 = vpop.permute.xlu1 %322  ;;  %v476_v46 = vmul.f32 %v460_v33, %v348_v21  ;;  %v373_v52 = vpop.permute.xlu2 %372 }
 0x10b   :  { %v471_v6 = vmul.f32 %v455_v27, %v323_v5  ;;  %v481_v53 = vmul.f32 %v465_v25, %v373_v52 }
 0x10d   :  { %v486_v12 = vadd.f32 %v485_v47, %v471_v6 }
 0x10f   :  { %v487_v16 = vadd.f32 %v486_v12, %v472_v11 }
 0x111   :  { %v488_v20 = vadd.f32 %v487_v16, %v473_v15  ;;  %v363_v41 = vpop.permute.xlu0 %362 }
 0x112   :  { %v338_v57 = vpop.permute.xlu1 %337  ;;  %v479_v0 = vmul.f32 %v463_v44, %v363_v41 }
 0x113   :  { %v474_v24 = vmul.f32 %v458_v19, %v338_v57 }
 0x115   :  { %v489_v1 = vadd.f32 %v488_v20, %v474_v24 }
 0x117   :  { %v490_v34 = vadd.f32 %v489_v1, %v475_v32 }
 0x119   :  { %v491_v4 = vadd.f32 %v490_v34, %v476_v46  ;;  %v379_v17 = vpop.permute.xlu0 %378 }
 0x11a   :  { %v353_v22 = vpop.permute.xlu1 %352  ;;  %v381_v62 = vperm.slane %v379_v17, 0 }
 0x11b   :  { %v477_v39 = vmul.f32 %v461_v36, %v353_v22 }
 0x11d   :  { %v492_v23 = vadd.f32 %v491_v4, %v477_v39 }
 0x11f   :  { %v493_v40 = vadd.f32 %v492_v23, %v478_v31 }
 0x121   :  { %v494_v51 = vadd.f32 %v493_v40, %v479_v0 }
 0x122   :  { %v368_v14 = vpop.permute.xlu1 %367 }
 0x123   :  { %v480_v30 = vmul.f32 %v464_v48, %v368_v14 }
 0x125   :  { %v495_v26 = vadd.f32 %v494_v51, %v480_v30 }
 0x127   :  { %v496_v54 = vadd.f32 %v495_v26, %v481_v53 }
 0x129   :  { %v497_v58 = vrot.slane %v496_v54, 4 }
 0x12b   :  { %v498_v59 = vadd.f32 %v497_v58, %v496_v54 }
 0x12d   :  { %v499_v60 = vrot.slane %v498_v59, 2 }
 0x12f   :  { %v500_v61 = vadd.f32 %v499_v60, %v498_v59 }
 0x131   :  { %v501_v28 = vrot.slane %v500_v61, 1 }
 0x133   :  { %v502_v63 = vadd.f32 %v501_v28, %v500_v61 }
 0x135   :  { %v503_v10 = vadd.f32 %v502_v63, %v381_v62 }
 0x137   :  { %v504_v45 = vmul.f32 0.5, %v503_v10 }
 0x139   :  { %538 = vtanh.f32 %v504_v45 }
 0x13f   :  { %v539_v2 = vpop.eup %538 }
 0x140   :  { %v506_v3 = vmul.f32 0.5, %v539_v2 }
 0x142   :  { %v507_v42 = vadd.f32 0.5, %v506_v3 }
 0x144   :  { %508 = vst [vmem:[#allocation3] sm:$0x1] %v507_v42 }
 0x145   :  { %519 = dma.vmem_to_hbm [thread:$0]  %s515_s10, 16, %s517_s13, [#allocation4]  }
 0x146   :  { %564 = dma.done.wait [#allocation4], 16  }
 0x147   :  { %565 = vsyncadd [#allocation4], 4294967280 }
 0x148   :  { %524 = vsyncpa [#allocation4], 1 }

</bundles_post_ra>
